<compile_context>
chip_gen: v7x
topology: tpu7x:2x2x1
jax: 0.10.0
libtpu: 0.0.40
codegen_flags: <defaults>
</compile_context>

<pallas_src>
import functools

import jax
import jax.numpy as jnp
import numpy as np
from jax import lax
from jax.experimental import pallas as pl
from jax.experimental.pallas import tpu as pltpu


def _round_up(x, m):
    return ((x + m - 1) // m) * m


def _pick_tile(total, candidates):
    """Largest candidate that evenly divides `total` (falls back to `total`)."""
    for c in candidates:
        if total % c == 0:
            return c
    return total


# ----------------------------- Pallas kernels ------------------------------

def _conv_matmul_stats_kernel(w_ref, p_ref, y_ref, s1_ref, s2_ref):
    # (Cout, K) @ (K, TL) -> (Cout, TL): bf16 operands, f32 MXU accumulation.
    y = jnp.dot(w_ref[...], p_ref[...], preferred_element_type=jnp.float32)
    # Fused per-tile BatchNorm partial statistics, accumulated in f32 *before*
    # the bf16 down-cast of y.  Padded lane columns of p are zero -> contribute 0.
    s1_ref[...] = jnp.sum(y, axis=1, keepdims=True)          # (Cout, 1)
    s2_ref[...] = jnp.sum(y * y, axis=1, keepdims=True)      # (Cout, 1)
    y_ref[...] = y.astype(y_ref.dtype)                        # bf16 store (lane-dense)
    # TODO(synk): at production Cout/nL, lay the stats out lane-major (e.g. (..., 2, Cout))
    # or accumulate in a VMEM scratch to avoid 1-lane masked stores; negligible here.


def _bn_hswish_kernel(y_ref, scale_ref, bias_ref, o_ref):
    # BatchNorm affine (train-mode stats folded into scale/bias) + Hswish:
    #   hswish(y) = y * relu6(y + 3) / 6
    # bf16 is a storage format only; all math in f32 (no bf16 VPU on v5e).
    y = y_ref[...].astype(jnp.float32) * scale_ref[...] + bias_ref[...]
    sw = jnp.clip(y + 3.0, 0.0, 6.0)
    o_ref[...] = (y * sw * (1.0 / 6.0)).astype(o_ref.dtype)


# ------------------------------- forward -----------------------------------

def conv_set_forward(x, weight, gamma, beta, *, stride, padding, eps=1e-5):
    """x: (N, Cin, H, W) NCHW; weight: (Cout, Cin, KH, KW) (PyTorch OIHW)."""
    n, cin, h, w = x.shape
    cout, cin_w, kh, kw = weight.shape
    assert cin == cin_w
    oh = (h + 2 * padding - kh) // stride + 1
    ow = (w + 2 * padding - kw) // stride + 1
    K = cin * kh * kw
    L = oh * ow

    # Patch extraction as one fused XLA op on a bf16 input, so the im2col array
    # is only ever materialized in bf16.  Output channels are ordered
    # (Cin, KH, KW) -- exactly matching weight.reshape(Cout, Cin*KH*KW).
    patches = lax.conv_general_dilated_patches(
        x.astype(jnp.bfloat16), (kh, kw), (stride, stride),
        [(padding, padding), (padding, padding)],
        dimension_numbers=("NCHW", "OIHW", "NCHW"))           # (N, K, OH, OW) bf16
    patches = patches.reshape(n, K, L)                         # (N, K, L)

    # Pad L only to a lane multiple (128); pick TL as a divisor of Lp.
    Lp = _round_up(L, 128)
    if Lp != L:
        patches = jnp.pad(patches, ((0, 0), (0, 0), (0, Lp - L)))
    TL = _pick_tile(Lp, (512, 256, 128))
    nL = Lp // TL

    w_mat = weight.reshape(cout, K).astype(jnp.bfloat16)       # (Cout, K)

    cparams = pltpu.CompilerParams(
        dimension_semantics=("parallel", "parallel"),
        vmem_limit_bytes=48 * 1024 * 1024)

    # --- kernel #1: conv as transposed im2col matmul (y^T = W @ patches),
    #     y stored in bf16, BN partial sums (f32) fused in.
    y, s1, s2 = pl.pallas_call(
        _conv_matmul_stats_kernel,
        out_shape=(jax.ShapeDtypeStruct((n, cout, Lp), jnp.bfloat16),
                   jax.ShapeDtypeStruct((n, nL, cout, 1), jnp.float32),
                   jax.ShapeDtypeStruct((n, nL, cout, 1), jnp.float32)),
        grid_spec=pltpu.PrefetchScalarGridSpec(
            num_scalar_prefetch=0,
            grid=(n, nL),
            in_specs=[pl.BlockSpec((cout, K), lambda b, l: (0, 0)),
                      pl.BlockSpec((None, K, TL), lambda b, l: (b, 0, l))],
            out_specs=[pl.BlockSpec((None, cout, TL), lambda b, l: (b, 0, l)),
                       pl.BlockSpec((None, None, cout, 1),
                                    lambda b, l: (b, l, 0, 0)),
                       pl.BlockSpec((None, None, cout, 1),
                                    lambda b, l: (b, l, 0, 0))],
        ),
        compiler_params=cparams,
    )(w_mat, patches)

    # --- tiny cross-tile reduction -> training-mode BatchNorm2d scale/bias.
    # TODO(synk): use a centered / Welford-style combine at production sizes;
    # E[y^2]-E[y]^2 can cancel catastrophically when |mean| >> std.
    count = jnp.float32(n * L)
    s1_tot = jnp.sum(s1, axis=(0, 1, 3))                       # (Cout,)
    s2_tot = jnp.sum(s2, axis=(0, 1, 3))                       # (Cout,)
    mean = s1_tot / count
    var = jnp.maximum(s2_tot / count - mean * mean, 0.0)       # biased, like PyTorch BN
    scale = gamma * lax.rsqrt(var + eps)
    bias = beta - mean * scale
    # TODO(synk): running_mean/running_var momentum updates are a training-time
    # side effect of nn.BatchNorm2d and do not affect the forward output.

    # --- kernel #2: fused BN affine + Hswish over a flattened (N*Cout, L) view.
    # Reads bf16 y, writes the UNPADDED f32 output directly; the last lane block
    # (when L % TL2 != 0) is a masked boundary store -> no post-kernel slice copy.
    R = n * cout
    y2 = y.reshape(R, Lp)
    scale_rows = jnp.tile(scale, n).reshape(R, 1).astype(jnp.float32)
    bias_rows = jnp.tile(bias, n).reshape(R, 1).astype(jnp.float32)

    TM2 = _pick_tile(R, (256, 128, 64, 32, 16, 8))
    TL2 = _pick_tile(Lp, (2048, 1024, 512, 256, 128))
    nR = R // TM2
    nL2 = Lp // TL2     # == cdiv(L, TL2); last block partially covers L

    out = pl.pallas_call(
        _bn_hswish_kernel,
        out_shape=jax.ShapeDtypeStruct((R, L), jnp.float32),
        grid_spec=pltpu.PrefetchScalarGridSpec(
            num_scalar_prefetch=0,
            grid=(nR, nL2),
            in_specs=[pl.BlockSpec((TM2, TL2), lambda r, l: (r, l)),
                      pl.BlockSpec((TM2, 1), lambda r, l: (r, 0)),
                      pl.BlockSpec((TM2, 1), lambda r, l: (r, 0))],
            out_specs=pl.BlockSpec((TM2, TL2), lambda r, l: (r, l)),
        ),
        compiler_params=cparams,
    )(y2, scale_rows, bias_rows)

    # Output rows are already NCHW-ordered (batch-major, channel-minor).
    return out.reshape(n, cout, oh, ow)


def _reference(x, weight, gamma, beta, stride, padding, eps=1e-5):
    y = lax.conv_general_dilated(
        x, weight, (stride, stride),
        [(padding, padding), (padding, padding)],
        dimension_numbers=("NCHW", "OIHW", "NCHW"))
    mean = jnp.mean(y, axis=(0, 2, 3), keepdims=True)
    var = jnp.var(y, axis=(0, 2, 3), keepdims=True)
    yn = (y - mean) * lax.rsqrt(var + eps)
    yn = yn * gamma.reshape(1, -1, 1, 1) + beta.reshape(1, -1, 1, 1)
    return yn * jnp.clip(yn + 3.0, 0.0, 6.0) / 6.0


if __name__ == "__main__":
    # conv_set(in_ch=4, out_ch=8, kernel_size=3, stride=1, padding=1)
    N, Cin, H, W = 2, 4, 16, 16
    Cout, KH, KW, stride, padding = 8, 3, 3, 1, 1

    key = jax.random.PRNGKey(0)
    k1, k2, k3, k4 = jax.random.split(key, 4)
    x = jax.random.normal(k1, (N, Cin, H, W), dtype=jnp.float32)
    weight = 0.1 * jax.random.normal(k2, (Cout, Cin, KH, KW), dtype=jnp.float32)
    gamma = 1.0 + 0.1 * jax.random.normal(k3, (Cout,), dtype=jnp.float32)
    beta = 0.1 * jax.random.normal(k4, (Cout,), dtype=jnp.float32)

    fwd = jax.jit(functools.partial(conv_set_forward, stride=stride,
                                    padding=padding))
    out = jax.block_until_ready(fwd(x, weight, gamma, beta))

    ref = _reference(x, weight, gamma, beta, stride, padding)
    np.testing.assert_allclose(np.asarray(out), np.asarray(ref),
                               atol=5e-2, rtol=5e-2)
    print("KERNEL_OK")
</pallas_src>

<mosaic_0001>
module attributes {stable_mosaic.version = 11 : i64} {
  func.func @_conv_matmul_stats_kernel(%arg0: i32, %arg1: i32, %arg2: memref<8x36xbf16, #tpu.memory_space<vmem>>, %arg3: memref<1x36x256xbf16, #tpu.memory_space<vmem>>, %arg4: memref<1x8x256xbf16, #tpu.memory_space<vmem>>, %arg5: memref<1x1x8x1xf32, #tpu.memory_space<vmem>>, %arg6: memref<1x1x8x1xf32, #tpu.memory_space<vmem>>) attributes {dimension_semantics = [#tpu.dimension_semantics<parallel>, #tpu.dimension_semantics<parallel>], iteration_bounds = array<i64: 2, 1>, scalar_prefetch = 0 : i64, scratch_operands = 0 : i64, tpu.core_type = #tpu.core_type<tc>, window_params = [{pipeline_mode = #tpu.pipeline_mode<synchronous>, transform_indices = @transform_0, window_bounds = array<i64: 8, 36>}, {transform_indices = @transform_1, window_bounds = array<i64: 1, 36, 256>}, {transform_indices = @transform_2, window_bounds = array<i64: 1, 8, 256>}, {transform_indices = @transform_3, window_bounds = array<i64: 1, 1, 8, 1>}, {transform_indices = @transform_4, window_bounds = array<i64: 1, 1, 8, 1>}]} {
    %c0 = arith.constant 0 : index
    %c0_0 = arith.constant 0 : index
    %0 = vector.load %arg2[%c0, %c0_0] : memref<8x36xbf16, #tpu.memory_space<vmem>>, vector<8x36xbf16>
    %c0_1 = arith.constant 0 : index
    %c0_2 = arith.constant 0 : index
    %c0_3 = arith.constant 0 : index
    %1 = vector.load %arg3[%c0_1, %c0_2, %c0_3] : memref<1x36x256xbf16, #tpu.memory_space<vmem>>, vector<1x36x256xbf16>
    %2 = vector.shape_cast %1 : vector<1x36x256xbf16> to vector<36x256xbf16>
    %cst = arith.constant dense<0.000000e+00> : vector<8x256xf32>
    %3 = tpu.matmul %0, %2, %cst {dimension_numbers = #tpu.dot_dimension_numbers<[1], [0], [0], [1], [0, 0, 1, 1], [], []>} : vector<8x36xbf16>, vector<36x256xbf16>, vector<8x256xf32> -> vector<8x256xf32>
    %cst_4 = arith.constant dense<0.000000e+00> : vector<8xf32>
    %4 = vector.multi_reduction <add>, %3, %cst_4 [1] : vector<8x256xf32> to vector<8xf32>
    %5 = vector.shape_cast %4 : vector<8xf32> to vector<8x1xf32>
    %c0_5 = arith.constant 0 : index
    %c0_6 = arith.constant 0 : index
    %c0_7 = arith.constant 0 : index
    %c0_8 = arith.constant 0 : index
    %6 = vector.load %arg5[%c0_5, %c0_6, %c0_7, %c0_8] : memref<1x1x8x1xf32, #tpu.memory_space<vmem>>, vector<1x1x8x1xf32>
    %7 = vector.shape_cast %6 : vector<1x1x8x1xf32> to vector<8x1xf32>
    %8 = vector.shape_cast %5 : vector<8x1xf32> to vector<1x1x8x1xf32>
    tpu.vector_store %arg5[%c0_5, %c0_6, %c0_7, %c0_8], %8 {strides = array<i32>} : memref<1x1x8x1xf32, #tpu.memory_space<vmem>>, vector<1x1x8x1xf32>,
    %9 = arith.mulf %3, %3 : vector<8x256xf32>
    %cst_9 = arith.constant dense<0.000000e+00> : vector<8xf32>
    %10 = vector.multi_reduction <add>, %9, %cst_9 [1] : vector<8x256xf32> to vector<8xf32>
    %11 = vector.shape_cast %10 : vector<8xf32> to vector<8x1xf32>
    %c0_10 = arith.constant 0 : index
    %c0_11 = arith.constant 0 : index
    %c0_12 = arith.constant 0 : index
    %c0_13 = arith.constant 0 : index
    %12 = vector.load %arg6[%c0_10, %c0_11, %c0_12, %c0_13] : memref<1x1x8x1xf32, #tpu.memory_space<vmem>>, vector<1x1x8x1xf32>
    %13 = vector.shape_cast %12 : vector<1x1x8x1xf32> to vector<8x1xf32>
    %14 = vector.shape_cast %11 : vector<8x1xf32> to vector<1x1x8x1xf32>
    tpu.vector_store %arg6[%c0_10, %c0_11, %c0_12, %c0_13], %14 {strides = array<i32>} : memref<1x1x8x1xf32, #tpu.memory_space<vmem>>, vector<1x1x8x1xf32>,
    %15 = arith.truncf %3 : vector<8x256xf32> to vector<8x256xbf16>
    %c0_14 = arith.constant 0 : index
    %c0_15 = arith.constant 0 : index
    %c0_16 = arith.constant 0 : index
    %16 = vector.load %arg4[%c0_14, %c0_15, %c0_16] : memref<1x8x256xbf16, #tpu.memory_space<vmem>>, vector<1x8x256xbf16>
    %17 = vector.shape_cast %16 : vector<1x8x256xbf16> to vector<8x256xbf16>
    %18 = vector.shape_cast %15 : vector<8x256xbf16> to vector<1x8x256xbf16>
    tpu.vector_store %arg4[%c0_14, %c0_15, %c0_16], %18 {strides = array<i32>} : memref<1x8x256xbf16, #tpu.memory_space<vmem>>, vector<1x8x256xbf16>,
    return
  }
  func.func @transform_0(%arg0: i32, %arg1: i32) -> (i32, i32) {
    %c0_i32 = arith.constant 0 : i32
    %c0_i32_0 = arith.constant 0 : i32
    %c0_i32_1 = arith.constant 0 : i32
    return %c0_i32, %c0_i32_0 : i32, i32
  }
  func.func @transform_1(%arg0: i32, %arg1: i32) -> (i32, i32, i32) {
    %c0_i32 = arith.constant 0 : i32
    %c0_i32_0 = arith.constant 0 : i32
    return %arg0, %c0_i32, %arg1 : i32, i32, i32
  }
  func.func @transform_2(%arg0: i32, %arg1: i32) -> (i32, i32, i32) {
    %c0_i32 = arith.constant 0 : i32
    %c0_i32_0 = arith.constant 0 : i32
    return %arg0, %c0_i32, %arg1 : i32, i32, i32
  }
  func.func @transform_3(%arg0: i32, %arg1: i32) -> (i32, i32, i32, i32) {
    %c0_i32 = arith.constant 0 : i32
    %c0_i32_0 = arith.constant 0 : i32
    %c0_i32_1 = arith.constant 0 : i32
    return %arg0, %arg1, %c0_i32, %c0_i32_0 : i32, i32, i32, i32
  }
  func.func @transform_4(%arg0: i32, %arg1: i32) -> (i32, i32, i32, i32) {
    %c0_i32 = arith.constant 0 : i32
    %c0_i32_0 = arith.constant 0 : i32
    %c0_i32_1 = arith.constant 0 : i32
    return %arg0, %arg1, %c0_i32, %c0_i32_0 : i32, i32, i32, i32
  }
}

module attributes {stable_mosaic.version = 11 : i64} {
  func.func @_bn_hswish_kernel(%arg0: i32, %arg1: i32, %arg2: memref<16x256xbf16, #tpu.memory_space<vmem>>, %arg3: memref<16x1xf32, #tpu.memory_space<vmem>>, %arg4: memref<16x1xf32, #tpu.memory_space<vmem>>, %arg5: memref<16x256xf32, #tpu.memory_space<vmem>>) attributes {dimension_semantics = [#tpu.dimension_semantics<parallel>, #tpu.dimension_semantics<parallel>], iteration_bounds = array<i64: 1, 1>, scalar_prefetch = 0 : i64, scratch_operands = 0 : i64, tpu.core_type = #tpu.core_type<tc>, window_params = [{transform_indices = @transform_0, window_bounds = array<i64: 16, 256>}, {transform_indices = @transform_1, window_bounds = array<i64: 16, 1>}, {transform_indices = @transform_2, window_bounds = array<i64: 16, 1>}, {transform_indices = @transform_3, window_bounds = array<i64: 16, 256>}]} {
    %c0 = arith.constant 0 : index
    %c0_0 = arith.constant 0 : index
    %0 = vector.load %arg2[%c0, %c0_0] : memref<16x256xbf16, #tpu.memory_space<vmem>>, vector<16x256xbf16>
    %1 = arith.extf %0 : vector<16x256xbf16> to vector<16x256xf32>
    %c0_1 = arith.constant 0 : index
    %c0_2 = arith.constant 0 : index
    %2 = vector.load %arg3[%c0_1, %c0_2] : memref<16x1xf32, #tpu.memory_space<vmem>>, vector<16x1xf32>
    %3 = vector.broadcast %2 : vector<16x1xf32> to vector<16x256xf32>
    %4 = arith.mulf %1, %3 : vector<16x256xf32>
    %c0_3 = arith.constant 0 : index
    %c0_4 = arith.constant 0 : index
    %5 = vector.load %arg4[%c0_3, %c0_4] : memref<16x1xf32, #tpu.memory_space<vmem>>, vector<16x1xf32>
    %6 = vector.broadcast %5 : vector<16x1xf32> to vector<16x256xf32>
    %7 = arith.addf %4, %6 : vector<16x256xf32>
    %cst = arith.constant 3.000000e+00 : f32
    %8 = vector.broadcast %cst : f32 to vector<16x256xf32>
    %9 = arith.addf %7, %8 : vector<16x256xf32>
    %cst_5 = arith.constant 0.000000e+00 : f32
    %cst_6 = arith.constant 6.000000e+00 : f32
    %10 = vector.broadcast %cst_5 : f32 to vector<16x256xf32>
    %11 = arith.maximumf %10, %9 : vector<16x256xf32>
    %12 = vector.broadcast %cst_6 : f32 to vector<16x256xf32>
    %13 = arith.minimumf %12, %11 : vector<16x256xf32>
    %14 = arith.mulf %7, %13 : vector<16x256xf32>
    %cst_7 = arith.constant 0.166666672 : f32
    %15 = vector.broadcast %cst_7 : f32 to vector<16x256xf32>
    %16 = arith.mulf %14, %15 : vector<16x256xf32>
    %c0_8 = arith.constant 0 : index
    %c0_9 = arith.constant 0 : index
    %17 = vector.load %arg5[%c0_8, %c0_9] : memref<16x256xf32, #tpu.memory_space<vmem>>, vector<16x256xf32>
    tpu.vector_store %arg5[%c0_8, %c0_9], %16 {strides = array<i32>} : memref<16x256xf32, #tpu.memory_space<vmem>>, vector<16x256xf32>,
    return
  }
  func.func @transform_0(%arg0: i32, %arg1: i32) -> (i32, i32) {
    %c0_i32 = arith.constant 0 : i32
    return %arg0, %arg1 : i32, i32
  }
  func.func @transform_1(%arg0: i32, %arg1: i32) -> (i32, i32) {
    %c0_i32 = arith.constant 0 : i32
    %c0_i32_0 = arith.constant 0 : i32
    return %arg0, %c0_i32 : i32, i32
  }
  func.func @transform_2(%arg0: i32, %arg1: i32) -> (i32, i32) {
    %c0_i32 = arith.constant 0 : i32
    %c0_i32_0 = arith.constant 0 : i32
    return %arg0, %c0_i32 : i32, i32
  }
  func.func @transform_3(%arg0: i32, %arg1: i32) -> (i32, i32) {
    %c0_i32 = arith.constant 0 : i32
    return %arg0, %arg1 : i32, i32
  }
}

</mosaic_0001>

<bundles_post_ra>
// kernel: tile.13
= control target key start
LH: loop header
LB: loop body
LE: loop exit
PB: predicated region body
PF: predicated region fallthrough
CT: control target
= control target key end

     0   :  { %s22_s0 = inlined_call_operand.vmem [shape: f32[8], index: 0, kind: input, shape index: {}]   ;;  %s23_s1 = inlined_call_operand.vmem [shape: f32[2,8], index: 1, kind: output, shape index: {}]  }
   0x1   :  { %v4_v0 = vld [vmem:[%s22_s0] ss:$0 sm:$0xff] }
   0x2   :  { %5 = vst [vmem:[%s23_s1] sm:$0x3] %v4_v0 }

// kernel: tile.0
= control target key start
LH: loop header
LB: loop body
LE: loop exit
PB: predicated region body
PF: predicated region fallthrough
CT: control target
= control target key end

     0   :  { %s66_s8 = smov 125   ;;  %vm7_vm0 = vcmask 7168   ;;  %s67_s11 = smov 126   ;;  %s117_s0 = inlined_call_operand.vmem [shape: f32[2,8], index: 0, kind: input, shape index: {}]   ;;  %s118_s1 = inlined_call_operand.vmem [shape: f32[16,1], index: 1, kind: output, shape index: {}]  }
   0x1   :  { %v4_v0 = vld [vmem:[%s117_s0] sm:$0x3]  ;;  %s65_s0 = smov 127   ;;  %s68_s12 = smov 124  }
   0x2   :  { %5 = vst [vmem:[#allocation0] sm:$0x3] %v4_v0  ;;  %s69_s13 = smov 123   ;;  %s70_s14 = smov 122  }
   0x3   :  { %s71_s15 = smov 121  }
   0x9   :  { %v9_v1 = vld [vmem:[#allocation0] sm:$0x3]  }
   0xa   :  { %v21_v2 = vld [vmem:[#allocation0] sm:$0x3]   ;;  %10 = vrot.lane.b32.xlu0 %v9_v1, %s65_s0 }
   0xb   :  { %22 = vrot.lane.b32.xlu1 %v21_v2, %s66_s8  ;;  %v15_v3 = vld [vmem:[#allocation0] sm:$0x3]  }
   0xc   :  { %v27_v4 = vld [vmem:[#allocation0] sm:$0x3]  }
   0xd   :  { %v6_v5 = vld [vmem:[#allocation0] sm:$0x3]  }
   0xe   :  { %8 = vst.msk [vmem:[%s118_s1] ss:$8 sm:$0x3] %vm7_vm0, %v6_v5   ;;  %16 = vrot.lane.b32.xlu0 %v15_v3, %s67_s11  ;;  %v33_v6 = vld [vmem:[#allocation0] sm:$0x3]  }
   0xf   :  { %28 = vrot.lane.b32.xlu1 %v27_v4, %s68_s12  ;;  %v39_v7 = vld [vmem:[#allocation0] sm:$0x3]  }
  0x10   :  { %v45_v8 = vld [vmem:[#allocation0] sm:$0x3]  }
  0x12   :  { %34 = vrot.lane.b32.xlu0 %v33_v6, %s69_s13 }
  0x13   :  { %40 = vrot.lane.b32.xlu1 %v39_v7, %s70_s14 }
  0x16   :  { %46 = vrot.lane.b32.xlu0 %v45_v8, %s71_s15 }
  0x7c   :  { %v11_v9 = vpop.permute.xlu0 %10  }
  0x7d   :  { %v23_v10 = vpop.permute.xlu1 %22   ;;  %51 = vst.msk [vmem:[%s118_s1 + $0x1] ss:$8 sm:$0x3] %vm7_vm0, %v11_v9  }
  0x7e   :  { %53 = vst.msk [vmem:[%s118_s1 + $0x3] ss:$8 sm:$0x3] %vm7_vm0, %v23_v10  }
  0x80   :  { %v17_v11 = vpop.permute.xlu0 %16  }
  0x81   :  { %v29_v12 = vpop.permute.xlu1 %28   ;;  %52 = vst.msk [vmem:[%s118_s1 + $0x2] ss:$8 sm:$0x3] %vm7_vm0, %v17_v11  }
  0x82   :  { %54 = vst.msk [vmem:[%s118_s1 + $0x4] ss:$8 sm:$0x3] %vm7_vm0, %v29_v12  }
  0x84   :  { %v35_v13 = vpop.permute.xlu0 %34  }
  0x85   :  { %v41_v14 = vpop.permute.xlu1 %40   ;;  %55 = vst.msk [vmem:[%s118_s1 + $0x5] ss:$8 sm:$0x3] %vm7_vm0, %v35_v13  }
  0x86   :  { %56 = vst.msk [vmem:[%s118_s1 + $0x6] ss:$8 sm:$0x3] %vm7_vm0, %v41_v14  }
  0x88   :  { %v47_v15 = vpop.permute.xlu0 %46  }
  0x89   :  { %57 = vst.msk [vmem:[%s118_s1 + $0x7] ss:$8 sm:$0x3] %vm7_vm0, %v47_v15  }

// kernel: conv_set_forward.3
= control target key start
LH: loop header
LB: loop body
LE: loop exit
PB: predicated region body
PF: predicated region fallthrough
CT: control target
= control target key end

     0   :  { %v83_v0 = vmov 0   ;;  %s134_s2 = inlined_call_operand.vmem [shape: f32[16,1], index: 2, kind: input, shape index: {}]   ;;  %s135_s1 = inlined_call_operand.vmem [shape: f32[16,1], index: 1, kind: input, shape index: {}]   ;;  %s136_s0 = inlined_call_operand.vmem [shape: bf16[16,256], index: 0, kind: input, shape index: {}]   ;;  %s137_s3 = inlined_call_operand.vmem [shape: f32[16,256], index: 3, kind: output, shape index: {}]  }
   0x1   :  { %82 = vset.pattern.permute.xlu1 %v83_v0  ;;  %81 = vset.pattern.permute.xlu0 %v83_v0  ;;  %v36_v1 = vld [vmem:[%s134_s2] sm:$0xff]  ;;  %v37_v3 = vld [vmem:[%s134_s2 + $0x8] sm:$0xff] }
   0x2   :  { %v20_v2 = vld [vmem:[%s135_s1] sm:$0xff]  ;;  %40 = vperm.xlu1 %82, %v36_v1   ;;  %v21_v4 = vld [vmem:[%s135_s1 + $0x8] sm:$0xff] }
   0x3   :  { %24 = vperm.xlu0 %81, %v20_v2   ;;  %v14_v5 = vld [vmem:[%s136_s0] sm:$0xff]  ;;  %v15_v8 = vld [vmem:[%s136_s0 + $0x8] sm:$0xff] }
   0x4   :  { %v16_v6 = vunpack.c.l.bf16 %v14_v5  ;;  %v17_v7 = vunpack.c.h.bf16 %v14_v5  ;;  %v18_v13 = vunpack.c.l.bf16 %v15_v8  ;;  %v19_v14 = vunpack.c.h.bf16 %v15_v8 }
   0x6   :  { %45 = vperm.xlu1 %82, %v37_v3  }
   0x7   :  { %29 = vperm.xlu0 %81, %v21_v4  }
  0x81   :  { %v41_v9 = vpop.permute.xlu1 %40 }
  0x82   :  { %v25_v10 = vpop.permute.xlu0 %24 }
  0x83   :  { %v32_v11 = vmul.f32 %v25_v10, %v16_v6  ;;  %v33_v12 = vmul.f32 %v25_v10, %v17_v7 }
  0x85   :  { %v48_v15 = vadd.f32 %v41_v9, %v32_v11  ;;  %v49_v16 = vadd.f32 %v41_v9, %v33_v12  ;;  %v46_v22 = vpop.permute.xlu1 %45 }
  0x86   :  { %v30_v17 = vpop.permute.xlu0 %29 }
  0x87   :  { %v52_v18 = vadd.f32 3.0, %v48_v15  ;;  %v53_v19 = vadd.f32 3.0, %v49_v16  ;;  %v34_v20 = vmul.f32 %v30_v17, %v18_v13  ;;  %v35_v21 = vmul.f32 %v30_v17, %v19_v14 }
  0x89   :  { %v56_v23 = vmax.f32 %v52_v18, 0.0  ;;  %v57_v24 = vmax.f32 %v53_v19, 0.0  ;;  %v50_v25 = vadd.f32 %v46_v22, %v34_v20  ;;  %v51_v26 = vadd.f32 %v46_v22, %v35_v21 }
  0x8b   :  { %v60_v27 = vmin.f32 %v56_v23, 6.0  ;;  %v61_v28 = vmin.f32 %v57_v24, 6.0  ;;  %v54_v29 = vadd.f32 3.0, %v50_v25  ;;  %v55_v30 = vadd.f32 3.0, %v51_v26 }
  0x8d   :  { %v64_v31 = vmul.f32 %v60_v27, %v48_v15  ;;  %v65_v32 = vmul.f32 %v61_v28, %v49_v16  ;;  %v58_v33 = vmax.f32 %v54_v29, 0.0  ;;  %v59_v34 = vmax.f32 %v55_v30, 0.0 }
  0x8f   :  { %v68_v35 = vmul.f32 0.16666667, %v64_v31  ;;  %v69_v36 = vmul.f32 0.16666667, %v65_v32  ;;  %v62_v37 = vmin.f32 %v58_v33, 6.0  ;;  %v63_v38 = vmin.f32 %v59_v34, 6.0 }
  0x91   :  { %72 = vst [vmem:[%s137_s3] sm:$0xff] %v68_v35  ;;  %73 = vst [vmem:[%s137_s3 + $0x8] sm:$0xff] %v69_v36  ;;  %v66_v39 = vmul.f32 %v62_v37, %v50_v25  ;;  %v67_v40 = vmul.f32 %v63_v38, %v51_v26 }
  0x93   :  { %v70_v41 = vmul.f32 0.16666667, %v66_v39  ;;  %v71_v42 = vmul.f32 0.16666667, %v67_v40 }
  0x95   :  { %74 = vst [vmem:[%s137_s3 + $0x10] sm:$0xff] %v70_v41  ;;  %75 = vst [vmem:[%s137_s3 + $0x18] sm:$0xff] %v71_v42 }

// kernel: conv_set_forward.2
= control target key start
LH: loop header
LB: loop body
LE: loop exit
PB: predicated region body
PF: predicated region fallthrough
CT: control target
= control target key end

     0   :  { %s654_s15 = smov 0   ;;  %s656_s16 = smov 0   ;;  %s696_s0 = inlined_call_operand.vmem [shape: bf16[8,36], index: 0, kind: input, shape index: {}]   ;;  %s697_s1 = inlined_call_operand.vmem [shape: bf16[2,36,256], index: 1, kind: input, shape index: {}]   ;;  %s698_s2 = inlined_call_operand.vmem [shape: bf16[2,8,256], index: 2, kind: output, shape index: {0}]   ;;  %s699_s3 = inlined_call_operand.vmem [shape: f32[2,1,8,1], index: 3, kind: output, shape index: {1}]   ;;  %s700_s4 = inlined_call_operand.vmem [shape: f32[2,1,8,1], index: 4, kind: output, shape index: {2}]  }
   0x1   :  { %s658_s17 = smov 0  }
   0x2 LB: > { %s27_s18 = sadd.s32 1, %s622_s16  ;;  %p551_p0 = scmp.ge.s32.totalorder %s626_s17, 1  ;;  %s626_s17 = sphi %s658_s17, %s15_s17   ;;  %s622_s16 = sphi %s656_s16, %s702_s16   ;;  %s618_s15 = sphi %s654_s15, %s701_s15  }
   0x3   : > { %p29_p1 = scmp.ge.s32.totalorder %s27_s18, 2  ;;  %p192_p2 = scmp.lt.s32.totalorder %s626_s17, 3 }
   0x5   : > { %s704_s18 = smov (%p29_p1, %s27_s18), 0  ;;  %p193_p3 = pnand %p551_p0, %p192_p2 }
   0x6   : > { %p241_p4 = scmp.lt.s32.totalorder (!%p193_p3), %s618_s15, 1  ;;  %v628_v0 = vmov (!%p193_p3), 0   ;;  %vm310_vm0 = vcmask (!%p193_p3), 1041408   ;;  %v275_v9 = vld [vmem:[%s696_s0] sm:$0xf] (!%p193_p3)  ;;  %vm306_vm1 = vcmask (!%p193_p3), 293888  }
   0x7   : > { %196 = sbr.rel (%p193_p3) target bundleno = 393 (0x189), region = 28  ;;  %349 = vmatprep.mubr.bf16.mxu0 (!%p193_p3), %v628_v0  ;;  %vm361_vm2 = vcmask (!%p193_p3), 7168  }
   0xe   : > { %s706_s15 = smov (!%p241_p4, %s618_s15), 1 }
   0xf   : > { %s570_s19 = smul.u32 40, %s706_s15  ;;  %s568_s25 = sshll.u32 %s706_s15, 3 }
  0x10   : > { %s258_s28 = scalar_lea.vmem %s698_s2, %s568_s25  ;;  %s266_s5 = scalar_lea.vmem %s699_s3, %s568_s25 }
  0x11   : > { %s248_s22 = scalar_lea.vmem %s697_s1, %s570_s19  ;;  %s273_s8 = scalar_lea.vmem %s700_s4, %s568_s25 }
  0x12   : > { %v596_v1 = vld [vmem:[%s248_s22 + $0x4] ss:$8 sps:$4 sm:$0xff]   ;;  %v598_v2 = vld [vmem:[%s248_s22] ss:$8 sps:$4 sm:$0xff]   ;;  %v599_v3 = vld [vmem:[%s248_s22 + $0x14] ss:$8 sps:$4 sm:$0xff]  }
  0x13   : > { %317 = vmatprep.subr.bf16.mxu0 %v596_v1  ;;  %v280_v4 = vld [vmem:[%s248_s22 + $0x20] sm:$0x33]  ;;  %v601_v5 = vld [vmem:[%s248_s22 + $0x10] ss:$8 sps:$4 sm:$0xff]  }
  0x14   : > { %318 = vmatpush1.bf16.msra.mxu0 %v598_v2  ;;  %v562_v6 = vcombine.high %v280_v4, %v280_v4  ;;  %v561_v7 = vcombine.low %v280_v4, %v280_v4 }
  0x15   : > { %319 = vmatprep.subr.bf16.mxu0 %v599_v3 }
  0x16   : > { %v312_v8 = vsel %vm310_vm0, %v561_v7, 0 }
  0x18   : > { %320 = vmatpush1.bf16.msra.mxu0 %v601_v5 }
  0x19   : > { %563 = vmatprep.subr.msk.bf16.mxu0 %vm310_vm0, %v562_v6 }
  0x1c   : > { %322 = vmatpush1.bf16.msra.mxu0 %v312_v8 }
  0x1f   : > { %564 = vmatmul.mubr.msk.bf16.vlgmr.msra.gmra.mrb[0].mxu0 %vm306_vm1, %v275_v9 }
  0xf2   : > { %v351_v10 = vpop.f32.mrb[0].mxu0 }
  0xf3   : > { %v353_v11 = vpop.f32.mrb[1].mxu0  ;;  %v363_v12 = vmul.f32 %v351_v10, %v351_v10 }
  0xf4   : > { %v569_v13 = vpack.c.bf16 %v353_v11, %v351_v10  ;;  %v355_v14 = vpop.f32.mrb[2].mxu0  ;;  %v358_v15 = vadd.f32 %v353_v11, %v351_v10  ;;  %v364_v16 = vmul.f32 %v353_v11, %v353_v11 }
  0xf5   : > { %v356_v17 = vpop.f32.mrb[3].mxu0 }
  0xf6   : > { %377 = vst [vmem:[%s258_s28] sm:$0xff] %v569_v13  ;;  %359 = vadd.xlane.f32.xlu0 %v358_v15  ;;  %v365_v18 = vadd.f32 %v364_v16, %v363_v12 }
  0xfa   : > { %366 = vadd.xlane.f32.xlu0 %v365_v18 }
 0x183   : > { %v360_v19 = vpop.xlane.xlu0 %359 }
 0x184   : > { %362 = vst.msk [vmem:[%s266_s5] sm:$0xff] %vm361_vm2, %v360_v19 }
 0x187   : > { %v367_v20 = vpop.xlane.xlu0 %366 }
 0x188   : > { %368 = vst.msk [vmem:[%s273_s8] sm:$0xff] %vm361_vm2, %v367_v20 }
 0x189 PF: > { %s15_s17 = sadd.s32 1, %s626_s17   ;;  %s701_s15 = smov %s622_s16 }
 0x18a   : > { %p12_p5 = scmp.ge.s32.totalorder %s15_s17, 4   ;;  %s702_s16 = smov %s704_s18 }
 0x18c   :  { %14 = sbr.rel (!%p12_p5) target bundleno = 2 (0x2), region = 82 }

</bundles_post_ra>
